<compile_context>
chip_gen: v5e
topology: v5e:2x2
jax: 0.10.0
libtpu: 0.0.40
codegen_flags: <defaults>
</compile_context>

<pallas_src>
import functools

import jax
import jax.numpy as jnp
from jax import lax
from jax.experimental import pallas as pl
from jax.experimental.pallas import tpu as pltpu


def _round_up(x, m):
    return (x + m - 1) // m * m


def _normalize_kernel(x_ref, o_ref, ot_ref):
    """L2-normalize each row (matches F.normalize eps=1e-12); emit the block both
    row-major (mining LHS) and transposed (mining RHS, canonical k-major layout)."""
    x = x_ref[...].astype(jnp.float32)                          # (TM, D)
    ssq = jnp.sum(x * x, axis=-1, keepdims=True)                # (TM, 1) lane reduce (XLU)
    # rsqrt -> EUP slot; max(ssq, eps^2) reproduces F.normalize's clamp and keeps
    # padded all-zero rows at exactly zero (no NaN).
    inv = lax.rsqrt(jnp.maximum(ssq, 1e-24))
    y = x * inv
    o_ref[...] = y.astype(o_ref.dtype)
    ot_ref[...] = y.T.astype(ot_ref.dtype)                      # one-time O(n*d) transpose


def _mine_kernel(xr_ref, xct_ref, lr_ref, lc_ref, loss_ref,
                 pos_min_ref, neg_max_ref, *, tn, n_valid, margin, mask_cols):
    j = pl.program_id(1)
    last = pl.num_programs(1) - 1

    @pl.when(j == 0)
    def _():
        # Fills in sim-space: +1 <-> reference ap fill of -1 (dist), -1 <-> an fill of +1.
        pos_min_ref[...] = jnp.ones_like(pos_min_ref)
        neg_max_ref[...] = jnp.full_like(neg_max_ref, -1.0)

    # sim = xn_rows @ xn_cols^T, fed as the canonical (tm,k)@(k,tn) contraction on the
    # MXU (bf16 operands by default), f32 accumulate.
    sim = lax.dot_general(
        xr_ref[...], xct_ref[...],
        dimension_numbers=(((1,), (0,)), ((), ())),
        preferred_element_type=jnp.float32)                     # (TM, TN)

    same = lr_ref[...] == lc_ref[...]                           # (TM,1)==(1,TN) -> (TM,TN) bool

    def update(pos_cand, neg_cand):
        # dist = -sim  =>  hardest positive: max(dist|pos) = -min(sim|pos)
        #                  hardest negative: min(dist|neg) = -max(sim|neg)
        pos_min_ref[...] = jnp.minimum(pos_min_ref[...],
                                       jnp.min(pos_cand, axis=-1, keepdims=True))
        neg_max_ref[...] = jnp.maximum(neg_max_ref[...],
                                       jnp.max(neg_cand, axis=-1, keepdims=True))

    if mask_cols:
        # Only the last column block can contain padded columns; interior blocks skip
        # all the iota/valid work.
        @pl.when(j != last)
        def _():
            update(jnp.where(same, sim, 1.0), jnp.where(same, -1.0, sim))

        @pl.when(j == last)
        def _():
            col_ids = j * tn + lax.broadcasted_iota(jnp.int32, (1, tn), 1)
            valid = col_ids < n_valid                           # (1, TN)
            pos_c = jnp.where(jnp.logical_and(same, valid), sim, 1.0)
            neg_c = jnp.where(jnp.logical_and(jnp.logical_not(same), valid), sim, -1.0)
            update(pos_c, neg_c)
    else:
        update(jnp.where(same, sim, 1.0), jnp.where(same, -1.0, sim))

    @pl.when(j == last)
    def _():
        # relu(dist_ap - dist_an + margin) == relu(neg_max - pos_min + margin)
        loss_ref[...] = jnp.maximum(
            neg_max_ref[...] - pos_min_ref[...] + margin, 0.0)


def triplet_loss(features, labels, *, margin=0.3, use_bf16=True,
                 block_m=None, block_n=None):
    """features: (n, d) float, labels: (n,) int -> scalar float32 loss."""
    n, d = features.shape
    d_pad = _round_up(d, 128)                     # lane-align feature dim (zero pad is harmless)
    n_pad = _round_up(n, 128)

    feat_dtype = jnp.bfloat16 if use_bf16 else jnp.float32
    itemsize = 2 if use_bf16 else 4

    # ---- column tile (streamed axis): 512 lanes keeps the 2x256 MXU fed and
    # amortizes per-step overhead; shrink only for very large feature dims. ----
    if block_n is not None:
        tn = int(block_n)
    else:
        tn = min(512, n_pad)
        while tn > 128 and (tn // 2) % 128 == 0 and 2 * tn * d_pad * itemsize > (24 << 20):
            tn //= 2
    assert tn % 128 == 0
    n_pad = _round_up(n_pad, tn)

    # ---- row tile (resident axis): bigger TM cuts the (n/TM)-fold re-streaming of
    # xn, but keep >= 2 row blocks whenever n permits so the 'parallel' grid axis
    # shards across both v7x TensorCores. ----
    if block_m is not None:
        tm = int(block_m)
    else:
        if n_pad // 128 < 2:
            tm = n_pad                                           # tiny batch: single 128-row block
        elif (n_pad >= 2048 and n_pad % 512 == 0
              and 2 * (512 + tn) * d_pad * itemsize <= (40 << 20)):
            tm = 512                                             # large batch: halve column re-streaming
        elif (n_pad % 256 == 0 and n_pad // 256 >= 2
              and 2 * (256 + tn) * d_pad * itemsize <= (40 << 20)):
            tm = 256                                             # MXU-width tiles, >=2 blocks
        else:
            tm = 128
    assert tm % 128 == 0 and n_pad % tm == 0 and n_pad % tn == 0

    # Explicit scoped-VMEM limit sized from the tiles (double-buffered feature tiles
    # + small label/accumulator buffers), clamped to v7x's 64 MiB physical VMEM.
    feat_tiles = 2 * (tm + tn) * d_pad * itemsize
    vmem_limit = int(min(max(feat_tiles + 16 * tm * 4 + (2 << 20), 32 << 20), 64 << 20))

    x = jnp.pad(features.astype(jnp.float32), ((0, n_pad - n), (0, d_pad - d)))
    lab = jnp.pad(labels.astype(jnp.int32), (0, n_pad - n), constant_values=-1)
    lab_col = lab.reshape(n_pad, 1)
    lab_row = lab.reshape(1, n_pad)

    # ---- Prologue: normalize each row exactly once; emit xn and its transpose. ----
    xn, xn_t = pl.pallas_call(
        _normalize_kernel,
        out_shape=(jax.ShapeDtypeStruct((n_pad, d_pad), feat_dtype),
                   jax.ShapeDtypeStruct((d_pad, n_pad), feat_dtype)),
        grid_spec=pltpu.PrefetchScalarGridSpec(
            num_scalar_prefetch=0,
            grid=(n_pad // tm,),
            in_specs=[pl.BlockSpec((tm, d_pad), lambda i: (i, 0))],
            out_specs=[pl.BlockSpec((tm, d_pad), lambda i: (i, 0)),
                       pl.BlockSpec((d_pad, tm), lambda i: (0, i))],
        ),
        compiler_params=pltpu.CompilerParams(
            dimension_semantics=("parallel",),
            vmem_limit_bytes=vmem_limit),
    )(x)

    kernel = functools.partial(
        _mine_kernel, tn=tn, n_valid=n, margin=float(margin),
        mask_cols=(n_pad != n))

    per_row = pl.pallas_call(
        kernel,
        out_shape=jax.ShapeDtypeStruct((n_pad, 1), jnp.float32),
        grid_spec=pltpu.PrefetchScalarGridSpec(
            num_scalar_prefetch=0,
            grid=(n_pad // tm, n_pad // tn),
            in_specs=[
                pl.BlockSpec((tm, d_pad), lambda i, j: (i, 0)),   # row feature block (resident over j)
                pl.BlockSpec((d_pad, tn), lambda i, j: (0, j)),   # transposed col block (streamed)
                pl.BlockSpec((tm, 1), lambda i, j: (i, 0)),       # row labels
                pl.BlockSpec((1, tn), lambda i, j: (0, j)),       # col labels
            ],
            out_specs=pl.BlockSpec((tm, 1), lambda i, j: (i, 0)),
            scratch_shapes=[pltpu.VMEM((tm, 1), jnp.float32),     # running min(sim | pos)
                            pltpu.VMEM((tm, 1), jnp.float32)],    # running max(sim | neg)
        ),
        compiler_params=pltpu.CompilerParams(
            dimension_semantics=("parallel", "arbitrary"),
            vmem_limit_bytes=vmem_limit),
    )(xn, xn_t, lab_col, lab_row)

    # Final tiny reduction (MarginRankingLoss mean over the real n rows) in plain JAX.
    return jnp.sum(per_row[:n, 0]) / jnp.float32(n)


def _triplet_loss_ref(features, labels, margin=0.3):
    """Pure-JAX reference mirroring the PyTorch forward."""
    x = features / jnp.maximum(
        jnp.linalg.norm(features, axis=-1, keepdims=True), 1e-12)
    dist = -x @ x.T
    mask = (labels[:, None] == labels[None, :]).astype(jnp.float32)
    dist_ap = jnp.max(dist * mask - (1.0 - mask), axis=-1)
    dist_an = jnp.min(dist * (1.0 - mask) + mask, axis=-1)
    return jnp.mean(jnp.maximum(dist_ap - dist_an + margin, 0.0))


if __name__ == "__main__":
    key = jax.random.PRNGKey(0)
    k1, k2, k3 = jax.random.split(key, 3)

    # Case 1: shape implied by the module (batch=8, feat_dim=32).
    feats1 = jax.random.normal(k1, (8, 32), dtype=jnp.float32)
    labels1 = jnp.array([0, 0, 1, 1, 2, 2, 3, 3], dtype=jnp.int32)
    ref1 = _triplet_loss_ref(feats1, labels1)

    # 1a: default (bf16 MXU operands, f32 accumulate) — deliberate precision tradeoff.
    out1_bf16 = triplet_loss(feats1, labels1)
    jax.block_until_ready(out1_bf16)
    assert jnp.allclose(out1_bf16, ref1, atol=5e-2, rtol=5e-2), (out1_bf16, ref1)

    # 1b: f32 path — exact parity with the PyTorch reference.
    out1_f32 = triplet_loss(feats1, labels1, use_bf16=False)
    jax.block_until_ready(out1_f32)
    assert jnp.allclose(out1_f32, ref1, atol=1e-5, rtol=1e-5), (out1_f32, ref1)

    # Case 2: non-aligned batch, multiple row AND column tiles (running accumulators
    # across the 'arbitrary' axis, last-block column masking, epilogue), f32 path.
    feats2 = jax.random.normal(k2, (130, 48), dtype=jnp.float32)
    labels2 = jnp.arange(130, dtype=jnp.int32) // 2
    ref2 = _triplet_loss_ref(feats2, labels2)
    out2_f32 = triplet_loss(feats2, labels2, use_bf16=False, block_m=128, block_n=128)
    jax.block_until_ready(out2_f32)
    assert jnp.allclose(out2_f32, ref2, atol=1e-5, rtol=1e-5), (out2_f32, ref2)

    # Case 2 again with default tile selection + default bf16 path.
    out2_bf16 = triplet_loss(feats2, labels2)
    jax.block_until_ready(out2_bf16)
    assert jnp.allclose(out2_bf16, ref2, atol=5e-2, rtol=5e-2), (out2_bf16, ref2)

    # Case 3: exactly aligned batch (no padding anywhere) with multiple column blocks —
    # exercises the unmasked interior-block path, f32 tight tolerance.
    feats3 = jax.random.normal(k3, (256, 128), dtype=jnp.float32)
    labels3 = jnp.arange(256, dtype=jnp.int32) % 32
    ref3 = _triplet_loss_ref(feats3, labels3)
    out3_f32 = triplet_loss(feats3, labels3, use_bf16=False, block_n=128)
    jax.block_until_ready(out3_f32)
    assert jnp.allclose(out3_f32, ref3, atol=1e-5, rtol=1e-5), (out3_f32, ref3)

    print("KERNEL_OK")
</pallas_src>

<mosaic_0001>
module attributes {stable_mosaic.version = 11 : i64} {
  func.func @_normalize_kernel(%arg0: i32, %arg1: memref<128x128xf32, #tpu.memory_space<vmem>>, %arg2: memref<128x128xbf16, #tpu.memory_space<vmem>>, %arg3: memref<128x128xbf16, #tpu.memory_space<vmem>>) attributes {dimension_semantics = [#tpu.dimension_semantics<parallel>], iteration_bounds = array<i64: 1>, scalar_prefetch = 0 : i64, scratch_operands = 0 : i64, tpu.core_type = #tpu.core_type<tc>, window_params = [{transform_indices = @transform_0, window_bounds = array<i64: 128, 128>}, {transform_indices = @transform_1, window_bounds = array<i64: 128, 128>}, {transform_indices = @transform_2, window_bounds = array<i64: 128, 128>}]} {
    %c0 = arith.constant 0 : index
    %c0_0 = arith.constant 0 : index
    %0 = vector.load %arg1[%c0, %c0_0] : memref<128x128xf32, #tpu.memory_space<vmem>>, vector<128x128xf32>
    %1 = arith.mulf %0, %0 : vector<128x128xf32>
    %cst = arith.constant dense<0.000000e+00> : vector<128xf32>
    %2 = vector.multi_reduction <add>, %1, %cst [1] : vector<128x128xf32> to vector<128xf32>
    %3 = vector.shape_cast %2 : vector<128xf32> to vector<128x1xf32>
    %cst_1 = arith.constant 1.000000e-24 : f32
    %4 = vector.broadcast %cst_1 : f32 to vector<128x1xf32>
    %5 = arith.maximumf %3, %4 : vector<128x1xf32>
    %6 = math.rsqrt %5 : vector<128x1xf32>
    %7 = vector.broadcast %6 : vector<128x1xf32> to vector<128x128xf32>
    %8 = arith.mulf %0, %7 : vector<128x128xf32>
    %9 = arith.truncf %8 : vector<128x128xf32> to vector<128x128xbf16>
    %c0_2 = arith.constant 0 : index
    %c0_3 = arith.constant 0 : index
    %10 = vector.load %arg2[%c0_2, %c0_3] : memref<128x128xbf16, #tpu.memory_space<vmem>>, vector<128x128xbf16>
    tpu.vector_store %arg2[%c0_2, %c0_3], %9 {strides = array<i32>} : memref<128x128xbf16, #tpu.memory_space<vmem>>, vector<128x128xbf16>,
    %11 = tpu.transpose %8, [1, 0] : vector<128x128xf32> -> vector<128x128xf32>
    %12 = arith.truncf %11 : vector<128x128xf32> to vector<128x128xbf16>
    %c0_4 = arith.constant 0 : index
    %c0_5 = arith.constant 0 : index
    %13 = vector.load %arg3[%c0_4, %c0_5] : memref<128x128xbf16, #tpu.memory_space<vmem>>, vector<128x128xbf16>
    tpu.vector_store %arg3[%c0_4, %c0_5], %12 {strides = array<i32>} : memref<128x128xbf16, #tpu.memory_space<vmem>>, vector<128x128xbf16>,
    return
  }
  func.func @transform_0(%arg0: i32) -> (i32, i32) {
    %c0_i32 = arith.constant 0 : i32
    %c0_i32_0 = arith.constant 0 : i32
    return %arg0, %c0_i32 : i32, i32
  }
  func.func @transform_1(%arg0: i32) -> (i32, i32) {
    %c0_i32 = arith.constant 0 : i32
    %c0_i32_0 = arith.constant 0 : i32
    return %arg0, %c0_i32 : i32, i32
  }
  func.func @transform_2(%arg0: i32) -> (i32, i32) {
    %c0_i32 = arith.constant 0 : i32
    %c0_i32_0 = arith.constant 0 : i32
    return %c0_i32, %arg0 : i32, i32
  }
}

</mosaic_0001>

<bundles_post_ra>
// kernel: tpu_custom_call.1
= control target key start
LH: loop header
LB: loop body
LE: loop exit
PB: predicated region body
PF: predicated region fallthrough
CT: control target
= control target key end

     0   :  { %8 = vsyncpa [#allocation3], 0  ;;  %s990_s0 = inlined_call_operand.hbm [shape: f32[128,128], index: 0, kind: input, shape index: {}]   ;;  %s991_s1 = inlined_call_operand.hbm [shape: bf16[128,128], index: 1, kind: output, shape index: {0}]   ;;  %s992_s2 = inlined_call_operand.hbm [shape: bf16[128,128], index: 2, kind: output, shape index: {1}]  }
   0x1   :  { %9 = vsyncpa [#allocation4], 0 }
   0x2   :  { %10 = vsyncpa [#allocation7], 0  ;;  %s15_s11 = sshll.u32 %s990_s0, 4  ;;  %s628_s12 = smov [#allocation2]   ;;  %s16_s11 = int_to_ptr.hbm [resolvable:$true] %s15_s11 }
   0x3   :  { %s17_s13 = sshll.u32 %s628_s12, 4  ;;  %s629_s14 = smov 128   ;;  %s18_s13 = int_to_ptr.vmem [resolvable:$true] %s17_s13 }
   0x4   :  { %s630_s15 = smov 8  }
   0x5   :  { %23 = dma.hbm_to_vmem [thread:$0]  %s16_s11, 2048, %s18_s13, [#allocation3], %s629_s14, %s629_s14, %s630_s15  }
   0x6   :  { %622 = dma.done.wait [#allocation3], 2048  }
   0x7   :  { %623 = vsyncadd [#allocation3], 4294965248  ;;  %v653_v0 = vld [vmem:[#allocation2 + $0x10] sm:$0xff]  ;;  %v655_v1 = vld [vmem:[#allocation2] sm:$0xff]  ;;  %s386_s17 = sshll.u32 %s991_s1, 4  ;;  %s631_s18 = smov [#allocation5]   ;;  %s387_s17 = int_to_ptr.hbm [resolvable:$true] %s386_s17 }
   0x8   :  { %v46_v2 = vmul.f32 %v653_v0, %v653_v0  ;;  %v44_v3 = vmul.f32 %v655_v1, %v655_v1  ;;  %v661_v4 = vld [vmem:[#allocation2 + $0x20] sm:$0xff]  ;;  %v665_v6 = vld [vmem:[#allocation2 + $0x18] sm:$0xff]  ;;  %v667_v7 = vld [vmem:[#allocation2 + $0x8] sm:$0xff]  ;;  %s384_s19 = sshll.u32 %s631_s18, 4  ;;  %s632_s20 = smov 64   ;;  %s385_s19 = int_to_ptr.vmem [resolvable:$true] %s384_s19 }
   0x9   :  { %v48_v5 = vmul.f32 %v661_v4, %v661_v4  ;;  %v669_v8 = vld [vmem:[#allocation2 + $0x28] sm:$0xff]  ;;  %v47_v9 = vmul.f32 %v665_v6, %v665_v6  ;;  %v45_v10 = vmul.f32 %v667_v7, %v667_v7  ;;  %v677_v12 = vld [vmem:[#allocation2 + $0x38] sm:$0xff]  ;;  %v679_v13 = vld [vmem:[#allocation2 + $0x30] sm:$0xff]  ;;  %s633_s21 = smov 4   ;;  %s634_s1 = smov [#allocation6]  }
   0xa   :  { %64 = vadd.xlane.f32.xlu1 %v46_v2  ;;  %60 = vadd.xlane.f32.xlu0 %v44_v3  ;;  %v49_v11 = vmul.f32 %v669_v8, %v669_v8  ;;  %v681_v14 = vld [vmem:[#allocation2 + $0x40] sm:$0xff]  ;;  %v51_v15 = vmul.f32 %v677_v12, %v677_v12  ;;  %v50_v16 = vmul.f32 %v679_v13, %v679_v13  ;;  %v689_v18 = vld [vmem:[#allocation2 + $0x48] sm:$0xff]  ;;  %v691_v19 = vld [vmem:[#allocation2 + $0x50] sm:$0xff]  ;;  %s397_s22 = sshll.u32 %s634_s1, 4  ;;  %s399_s25 = sshll.u32 %s992_s2, 4  ;;  %s398_s22 = int_to_ptr.vmem [resolvable:$true] %s397_s22  ;;  %s400_s25 = int_to_ptr.hbm [resolvable:$true] %s399_s25 }
   0xb   :  { %68 = vadd.xlane.f32.xlu2 %v48_v5  ;;  %v52_v17 = vmul.f32 %v681_v14, %v681_v14  ;;  %v693_v20 = vld [vmem:[#allocation2 + $0x58] sm:$0xff]  ;;  %v53_v21 = vmul.f32 %v689_v18, %v689_v18  ;;  %v54_v22 = vmul.f32 %v691_v19, %v691_v19  ;;  %v701_v24 = vld [vmem:[#allocation2 + $0x68] sm:$0xff]  ;;  %v703_v25 = vld [vmem:[#allocation2 + $0x60] sm:$0xff] }
   0xc   :  { %v55_v23 = vmul.f32 %v693_v20, %v693_v20  ;;  %v705_v26 = vld [vmem:[#allocation2 + $0x70] sm:$0xff]  ;;  %v57_v27 = vmul.f32 %v701_v24, %v701_v24  ;;  %v56_v28 = vmul.f32 %v703_v25, %v703_v25  ;;  %v713_v30 = vld [vmem:[#allocation2 + $0x78] sm:$0xff] }
   0xd   :  { %v58_v29 = vmul.f32 %v705_v26, %v705_v26  ;;  %v59_v31 = vmul.f32 %v713_v30, %v713_v30 }
  0x12   :  { %66 = vadd.xlane.f32.xlu1 %v47_v9  ;;  %62 = vadd.xlane.f32.xlu0 %v45_v10 }
  0x13   :  { %70 = vadd.xlane.f32.xlu2 %v49_v11 }
  0x1a   :  { %74 = vadd.xlane.f32.xlu1 %v51_v15  ;;  %72 = vadd.xlane.f32.xlu0 %v50_v16 }
  0x1b   :  { %76 = vadd.xlane.f32.xlu2 %v52_v17 }
  0x22   :  { %78 = vadd.xlane.f32.xlu0 %v53_v21  ;;  %80 = vadd.xlane.f32.xlu1 %v54_v22 }
  0x23   :  { %82 = vadd.xlane.f32.xlu2 %v55_v23 }
  0x2a   :  { %86 = vadd.xlane.f32.xlu1 %v57_v27  ;;  %84 = vadd.xlane.f32.xlu0 %v56_v28 }
  0x2b   :  { %88 = vadd.xlane.f32.xlu2 %v58_v29 }
  0x32   :  { %90 = vadd.xlane.f32.xlu0 %v59_v31 }
  0x7d   :  { %v65_v32 = vpop.xlane.xlu1 %64  ;;  %v61_v33 = vpop.xlane.xlu0 %60 }
  0x7e   :  { %v94_v34 = vmax.f32 %v65_v32, 1e-24  ;;  %v92_v35 = vmax.f32 %v61_v33, 1e-24  ;;  %v69_v36 = vpop.xlane.xlu2 %68 }
  0x7f   :  { %v717_v37 = vmax.f32 %v69_v36, 1e-24 }
  0x80   :  { %518 = vrsqrt.f32 %v94_v34  ;;  %vm134_vm0 = vweird.f32 %v94_v34  ;;  %vm114_vm3 = vweird.f32 %v92_v35 }
  0x81   :  { %520 = vrsqrt.f32 %v92_v35  ;;  %vm154_vm4 = vweird.f32 %v717_v37 }
  0x82   :  { %522 = vrsqrt.f32 %v717_v37 }
  0x85   :  { %v67_v38 = vpop.xlane.xlu1 %66  ;;  %v63_v39 = vpop.xlane.xlu0 %62 }
  0x86   :  { %v720_v40 = vpop.eup %518  ;;  %v722_v41 = vmax.f32 %v67_v38, 1e-24  ;;  %v724_v42 = vmax.f32 %v63_v39, 1e-24  ;;  %v71_v43 = vpop.xlane.xlu2 %70 }
  0x87   :  { %v521_v44 = vpop.eup %520  ;;  %v129_v45 = vmul.f32 %v720_v40, %v94_v34  ;;  %v727_v46 = vmax.f32 %v71_v43, 1e-24  ;;  %vm135_vm2 = vweird.f32 %v720_v40 }
  0x88   :  { %v729_v47 = vpop.eup %522  ;;  %v109_v48 = vmul.f32 %v521_v44, %v92_v35  ;;  %524 = vrsqrt.f32 %v722_v41  ;;  %vm115_vm1 = vweird.f32 %v521_v44  ;;  %vm144_vm5 = vweird.f32 %v722_v41  ;;  %vm763_vm8 = vmor %vm134_vm0, %vm135_vm2 }
  0x89   :  { %v130_v49 = vmul.f32 %v720_v40, %v129_v45  ;;  %526 = vrsqrt.f32 %v724_v42  ;;  %v149_v50 = vmul.f32 %v729_v47, %v717_v37  ;;  %vm124_vm6 = vweird.f32 %v724_v42  ;;  %vm116_vm7 = vmor %vm114_vm3, %vm115_vm1 }
  0x8a   :  { %v110_v51 = vmul.f32 %v521_v44, %v109_v48  ;;  %528 = vrsqrt.f32 %v727_v46  ;;  %vm155_vm10 = vweird.f32 %v729_v47  ;;  %vm164_vm11 = vweird.f32 %v727_v46 }
  0x8b   :  { %v131_v52 = vmul.f32 0.5, %v130_v49  ;;  %v150_v53 = vmul.f32 %v729_v47, %v149_v50  ;;  %vm798_vm14 = vmor %vm154_vm4, %vm155_vm10 }
  0x8c   :  { %v111_v54 = vmul.f32 0.5, %v110_v51 }
  0x8d   :  { %v132_v55 = vsub.f32 1.5, %v131_v52  ;;  %v75_v56 = vpop.xlane.xlu1 %74  ;;  %v73_v57 = vpop.xlane.xlu0 %72  ;;  %v151_v60 = vmul.f32 0.5, %v150_v53 }
  0x8e   :  { %v738_v58 = vpop.eup %524  ;;  %v112_v59 = vsub.f32 1.5, %v111_v54  ;;  %v740_v61 = vmax.f32 %v75_v56, 1e-24  ;;  %v742_v62 = vmax.f32 %v73_v57, 1e-24  ;;  %v77_v63 = vpop.xlane.xlu2 %76 }
  0x8f   :  { %v744_v2 = vpop.eup %526  ;;  %v139_v3 = vmul.f32 %v738_v58, %v722_v41  ;;  %v133_v16 = vmul.f32 %v720_v40, %v132_v55  ;;  %v152_v22 = vsub.f32 1.5, %v151_v60  ;;  %vm145_vm9 = vweird.f32 %v738_v58 }
  0x90   :  { %v750_v5 = vpop.eup %528  ;;  %v119_v9 = vmul.f32 %v744_v2, %v724_v42  ;;  %v113_v10 = vmul.f32 %v521_v44, %v112_v59  ;;  %530 = vrsqrt.f32 %v740_v61  ;;  %v774_v32 = vmax.f32 %v77_v63, 1e-24  ;;  %vm786_vm13 = vmor %vm144_vm5, %vm145_vm9 }
  0x91   :  { %v140_v11 = vmul.f32 %v738_v58, %v139_v3  ;;  %v159_v15 = vmul.f32 %v750_v5, %v727_v46  ;;  %532 = vrsqrt.f32 %v742_v62  ;;  %vm125_vm12 = vweird.f32 %v744_v2 }
  0x92   :  { %v120_v21 = vmul.f32 %v744_v2, %v119_v9  ;;  %v117_v23 = vsel %vm116_vm7, %v521_v44, %v113_v10  ;;  %v137_v35 = vsel %vm763_vm8, %v720_v40, %v133_v16  ;;  %534 = vrsqrt.f32 %v774_v32  ;;  %vm126_vm2 = vmor %vm124_vm6, %vm125_vm12 }
  0x93   :  { %v141_v27 = vmul.f32 0.5, %v140_v11  ;;  %v160_v28 = vmul.f32 %v750_v5, %v159_v15  ;;  %v268_v29 = vmul.f32 %v117_v23, %v655_v1  ;;  %v153_v45 = vmul.f32 %v729_v47, %v152_v22 }
  0x94   :  { %v121_v31 = vmul.f32 0.5, %v120_v21  ;;  %vm165_vm15 = vweird.f32 %v750_v5  ;;  %vm184_vm0 = vweird.f32 %v740_v61  ;;  %vm174_vm1 = vweird.f32 %v742_v62 }
  0x95   :  { %v142_v33 = vsub.f32 1.5, %v141_v27  ;;  %v161_v34 = vmul.f32 0.5, %v160_v28  ;;  %316 = vxpose.xlu1.b32.start [1/16] %v268_v29, 128  ;;  %v79_v36 = vpop.xlane.xlu0 %78  ;;  %v81_v38 = vpop.xlane.xlu1 %80  ;;  %v270_v54 = vmul.f32 %v137_v35, %v653_v0  ;;  %v157_v42 = vsel %vm798_vm14, %v729_v47, %v153_v45  ;;  %vm836_vm3 = vmor %vm164_vm11, %vm165_vm15 }
  0x96   :  { %v780_v39 = vpop.eup %530  ;;  %v122_v43 = vsub.f32 1.5, %v121_v31  ;;  %v791_v44 = vmax.f32 %v79_v36, 1e-24  ;;  %v83_v49 = vpop.xlane.xlu2 %82  ;;  %v842_v63 = vmax.f32 %v81_v38, 1e-24  ;;  %v856_v17 = vmul.f32 %v157_v42, %v661_v4 }
  0x97   :  { %v179_v41 = vmul.f32 %v780_v39, %v740_v61  ;;  %v143_v48 = vmul.f32 %v738_v58, %v142_v33  ;;  %v807_v50 = vpop.eup %532  ;;  %v162_v52 = vsub.f32 1.5, %v161_v34  ;;  %v830_v59 = vmax.f32 %v83_v49, 1e-24 }
  0x98   :  { %v123_v51 = vmul.f32 %v744_v2, %v122_v43  ;;  %536 = vrsqrt.f32 %v791_v44  ;;  %v169_v53 = vmul.f32 %v807_v50, %v742_v62  ;;  %vm185_vm4 = vweird.f32 %v780_v39 }
  0x99   :  { %v180_v37 = vmul.f32 %v780_v39, %v179_v41  ;;  %v147_v55 = vsel %vm786_vm13, %v738_v58, %v143_v48  ;;  %538 = vrsqrt.f32 %v830_v59  ;;  %v163_v46 = vmul.f32 %v750_v5, %v162_v52  ;;  %vm869_vm6 = vmor %vm184_vm0, %vm185_vm4 }
  0x9a   :  { %v127_v56 = vsel %vm126_vm2, %v744_v2, %v123_v51  ;;  %v825_v57 = vmul.f32 %v147_v55, %v665_v6  ;;  %v170_v6 = vmul.f32 %v807_v50, %v169_v53  ;;  %v844_v2 = vpop.eup %534  ;;  %vm175_vm5 = vweird.f32 %v807_v50 }
  0x9b   :  { %v269_v58 = vmul.f32 %v127_v56, %v667_v7  ;;  %v181_v60 = vmul.f32 0.5, %v180_v37  ;;  %v189_v7 = vmul.f32 %v844_v2, %v774_v32  ;;  %540 = vrsqrt.f32 %v842_v63  ;;  %vm883_vm7 = vmor %vm174_vm1, %vm175_vm5 }
  0x9c   :  { %v425_v47 = vpack.c.bf16 %v825_v57, %v270_v54  ;;  %v171_v10 = vmul.f32 0.5, %v170_v6  ;;  %v167_v21 = vsel %vm836_vm3, %v750_v5, %v163_v46  ;;  %vm194_vm8 = vweird.f32 %v774_v32 }
  0x9d   :  { %v420_v3 = vpack.c.bf16 %v269_v58, %v268_v29  ;;  %317 = vxpose.xlu1.b32.cont [2/16] %v269_v58, 128  ;;  %v182_v9 = vsub.f32 1.5, %v181_v60  ;;  %v87_v11 = vpop.xlane.xlu1 %86  ;;  %v85_v15 = vpop.xlane.xlu0 %84  ;;  %v190_v23 = vmul.f32 %v844_v2, %v189_v7  ;;  %v874_v28 = vmul.f32 %v167_v21, %v669_v8 }
  0x9e   :  { %v852_v16 = vpop.eup %536  ;;  %497 = vst [vmem:[#allocation5 + $0x8] sm:$0xff] %v425_v47   ;;  %v172_v22 = vsub.f32 1.5, %v171_v10  ;;  %v876_v29 = vmax.f32 %v87_v11, 1e-24  ;;  %v878_v5 = vmax.f32 %v85_v15, 1e-24  ;;  %vm195_vm9 = vweird.f32 %v844_v2 }
  0x9f   :  { %421 = vst [vmem:[#allocation5] sm:$0xff] %v420_v3   ;;  %v199_v27 = vmul.f32 %v852_v16, %v791_v44  ;;  %v183_v31 = vmul.f32 %v780_v39, %v182_v9  ;;  %v191_v61 = vmul.f32 0.5, %v190_v23  ;;  %v539_v36 = vpop.eup %538  ;;  %v430_v8 = vpack.c.bf16 %v874_v28, %v856_v17  ;;  %vm906_vm12 = vmor %vm194_vm8, %vm195_vm9 }
  0xa0   :  { %v173_v35 = vmul.f32 %v807_v50, %v172_v22  ;;  %542 = vrsqrt.f32 %v876_v29  ;;  %vm204_vm10 = vweird.f32 %v791_v44  ;;  %v219_v1 = vmul.f32 %v539_v36, %v830_v59 }
  0xa1   :  { %v200_v34 = vmul.f32 %v852_v16, %v199_v27  ;;  %v192_v62 = vsub.f32 1.5, %v191_v61  ;;  %v541_v43 = vpop.eup %540  ;;  %vm205_vm11 = vweird.f32 %v852_v16  ;;  %498 = vst [vmem:[#allocation5 + $0x10] sm:$0xff] %v430_v8   ;;  %544 = vrsqrt.f32 %v878_v5 }
  0xa2   :  { %v177_v45 = vsel %vm883_vm7, %v807_v50, %v173_v35  ;;  %v187_v40 = vsel %vm869_vm6, %v780_v39, %v183_v31  ;;  %v220_v49 = vmul.f32 %v539_v36, %v219_v1  ;;  %v209_v51 = vmul.f32 %v541_v43, %v842_v63  ;;  %vm920_vm13 = vmor %vm204_vm10, %vm205_vm11 }
  0xa3   :  { %v201_v38 = vmul.f32 0.5, %v200_v34  ;;  %v912_v52 = vmul.f32 %v177_v45, %v679_v13  ;;  %v915_v50 = vmul.f32 %v187_v40, %v677_v12  ;;  %v193_v37 = vmul.f32 %v844_v2, %v192_v62 }
  0xa4   :  { %v221_v39 = vmul.f32 0.5, %v220_v49  ;;  %vm224_vm14 = vweird.f32 %v830_v59  ;;  %v210_v53 = vmul.f32 %v541_v43, %v209_v51  ;;  %vm225_vm15 = vweird.f32 %v539_v36 }
  0xa5   :  { %318 = vxpose.xlu1.b32.cont [3/16] %v270_v54, 128  ;;  %v202_v48 = vsub.f32 1.5, %v201_v38  ;;  %vm214_vm0 = vweird.f32 %v842_v63  ;;  %v435_v12 = vpack.c.bf16 %v915_v50, %v912_v52  ;;  %v197_v13 = vsel %vm906_vm12, %v844_v2, %v193_v37  ;;  %vm941_vm2 = vmor %vm224_vm14, %vm225_vm15 }
  0xa6   :  { %v543_v55 = vpop.eup %542  ;;  %v222_v44 = vsub.f32 1.5, %v221_v39  ;;  %v211_v56 = vmul.f32 0.5, %v210_v53  ;;  %vm215_vm1 = vweird.f32 %v541_v43  ;;  %v934_v58 = vmul.f32 %v197_v13, %v681_v14 }
  0xa7   :  { %v203_v54 = vmul.f32 %v852_v16, %v202_v48  ;;  %v239_v42 = vmul.f32 %v543_v55, %v876_v29  ;;  %v545_v0 = vpop.eup %544  ;;  %499 = vst [vmem:[#allocation5 + $0x18] sm:$0xff] %v435_v12   ;;  %vm948_vm3 = vmor %vm214_vm0, %vm215_vm1  ;;  %vm244_vm4 = vweird.f32 %v876_v29  ;;  %vm234_vm5 = vweird.f32 %v878_v5  ;;  %v91_v29 = vpop.xlane.xlu0 %90 }
  0xa8   :  { %v212_v2 = vsub.f32 1.5, %v211_v56  ;;  %v229_v46 = vmul.f32 %v545_v0, %v878_v5  ;;  %v223_v59 = vmul.f32 %v539_v36, %v222_v44  ;;  %vm245_vm6 = vweird.f32 %v543_v55 }
  0xa9   :  { %v207_v60 = vsel %vm920_vm13, %v852_v16, %v203_v54  ;;  %v240_v47 = vmul.f32 %v543_v55, %v239_v42  ;;  %vm235_vm7 = vweird.f32 %v545_v0  ;;  %vm246_vm8 = vmor %vm244_vm4, %vm245_vm6  ;;  %v107_v35 = vmax.f32 %v91_v29, 1e-24 }
  0xaa   :  { %v954_v14 = vmul.f32 %v207_v60, %v689_v18  ;;  %v230_v10 = vmul.f32 %v545_v0, %v229_v46  ;;  %v213_v7 = vmul.f32 %v541_v43, %v212_v2  ;;  %v227_v11 = vsel %vm941_vm2, %v539_v36, %v223_v59  ;;  %vm236_vm9 = vmor %vm234_vm5, %vm235_vm7 }
  0xab   :  { %v241_v9 = vmul.f32 0.5, %v240_v47  ;;  %vm264_vm12 = vweird.f32 %v107_v35 }
  0xac   :  { %v440_v63 = vpack.c.bf16 %v954_v14, %v934_v58  ;;  %v231_v16 = vmul.f32 0.5, %v230_v10  ;;  %v217_v18 = vsel %vm948_vm3, %v541_v43, %v213_v7 }
  0xad   :  { %319 = vxpose.xlu1.b32.cont [4/16] %v825_v57, 128  ;;  %v242_v15 = vsub.f32 1.5, %v241_v9  ;;  %v279_v57 = vmul.f32 %v227_v11, %v693_v20  ;;  %v278_v21 = vmul.f32 %v217_v18, %v691_v19  ;;  %v89_v19 = vpop.xlane.xlu2 %88 }
  0xae   :  { %500 = vst [vmem:[#allocation5 + $0x20] sm:$0xff] %v440_v63   ;;  %v232_v22 = vsub.f32 1.5, %v231_v16  ;;  %v106_v34 = vmax.f32 %v89_v19, 1e-24 }
  0xaf   :  { %v445_v23 = vpack.c.bf16 %v279_v57, %v278_v21  ;;  %v243_v4 = vmul.f32 %v543_v55, %v242_v15 }
  0xb0   :  { %v233_v27 = vmul.f32 %v545_v0, %v232_v22  ;;  %546 = vrsqrt.f32 %v106_v34  ;;  %vm254_vm10 = vweird.f32 %v106_v34 }
  0xb1   :  { %501 = vst [vmem:[#allocation5 + $0x28] sm:$0xff] %v445_v23   ;;  %v247_v31 = vsel %vm246_vm8, %v543_v55, %v243_v4  ;;  %548 = vrsqrt.f32 %v107_v35 }
  0xb2   :  { %v237_v5 = vsel %vm236_vm9, %v545_v0, %v233_v27  ;;  %v281_v20 = vmul.f32 %v247_v31, %v701_v24 }
  0xb3   :  { %v280_v33 = vmul.f32 %v237_v5, %v703_v25 }
  0xb5   :  { %320 = vxpose.xlu1.b32.cont [5/16] %v856_v17, 128  ;;  %v450_v61 = vpack.c.bf16 %v281_v20, %v280_v33 }
  0xb6   :  { %v547_v36 = vpop.eup %546 }
  0xb7   :  { %502 = vst [vmem:[#allocation5 + $0x30] sm:$0xff] %v450_v61   ;;  %v549_v17 = vpop.eup %548  ;;  %v249_v8 = vmul.f32 %v547_v36, %v106_v34  ;;  %vm255_vm11 = vweird.f32 %v547_v36 }
  0xb8   :  { %v259_v62 = vmul.f32 %v549_v17, %v107_v35  ;;  %vm265_vm13 = vweird.f32 %v549_v17  ;;  %vm256_vm14 = vmor %vm254_vm10, %vm255_vm11 }
  0xb9   :  { %v250_v38 = vmul.f32 %v547_v36, %v249_v8  ;;  %vm266_vm15 = vmor %vm264_vm12, %vm265_vm13 }
  0xba   :  { %v260_v25 = vmul.f32 %v549_v17, %v259_v62 }
  0xbb   :  { %v251_v1 = vmul.f32 0.5, %v250_v38 }
  0xbc   :  { %v261_v24 = vmul.f32 0.5, %v260_v25 }
  0xbd   :  { %321 = vxpose.xlu1.b32.cont [6/16] %v874_v28, 128  ;;  %v252_v43 = vsub.f32 1.5, %v251_v1 }
  0xbe   :  { %v262_v28 = vsub.f32 1.5, %v261_v24 }
  0xbf   :  { %v253_v45 = vmul.f32 %v547_v36, %v252_v43 }
  0xc0   :  { %v263_v40 = vmul.f32 %v549_v17, %v262_v28 }
  0xc1   :  { %v257_v41 = vsel %vm256_vm14, %v547_v36, %v253_v45 }
  0xc2   :  { %v267_v48 = vsel %vm266_vm15, %v549_v17, %v263_v40  ;;  %v282_v49 = vmul.f32 %v257_v41, %v705_v26 }
  0xc3   :  { %v283_v51 = vmul.f32 %v267_v48, %v713_v30 }
  0xc5   :  { %322 = vxpose.xlu1.b32.cont [7/16] %v912_v52, 128  ;;  %v455_v52 = vpack.c.bf16 %v283_v51, %v282_v49 }
  0xc7   :  { %503 = vst [vmem:[#allocation5 + $0x38] sm:$0xff] %v455_v52  }
  0xc8   :  { %392 = dma.vmem_to_hbm [thread:$0]  %s385_s19, 1024, %s387_s17, [#allocation4], %s632_s20, %s632_s20, %s633_s21  }
  0xcd   :  { %323 = vxpose.xlu1.b32.cont [8/16] %v915_v50, 128 }
  0xd5   :  { %324 = vxpose.xlu1.b32.cont [9/16] %v934_v58, 128 }
  0xdd   :  { %325 = vxpose.xlu1.b32.cont [10/16] %v954_v14, 128 }
  0xe5   :  { %326 = vxpose.xlu1.b32.cont [11/16] %v278_v21, 128 }
  0xed   :  { %327 = vxpose.xlu1.b32.cont [12/16] %v279_v57, 128 }
  0xf5   :  { %328 = vxpose.xlu1.b32.cont [13/16] %v280_v33, 128 }
  0xfd   :  { %329 = vxpose.xlu1.b32.cont [14/16] %v281_v20, 128 }
 0x105   :  { %330 = vxpose.xlu1.b32.cont [15/16] %v282_v49, 128 }
 0x10d   :  { %331 = vxpose.xlu1.b32.end [16/16] %v283_v51, 128 }
 0x139   :  { %v332_v26 = vpop.trf.xlu1 }
 0x141   :  { %v333_v30 = vpop.trf.xlu1 }
 0x142   :  { %v460_v50 = vpack.c.bf16 %v333_v30, %v332_v26 }
 0x144   :  { %461 = vst [vmem:[#allocation6] sm:$0xff] %v460_v50  }
 0x149   :  { %v334_v37 = vpop.trf.xlu1 }
 0x151   :  { %v335_v32 = vpop.trf.xlu1 }
 0x152   :  { %v465_v39 = vpack.c.bf16 %v335_v32, %v334_v37 }
 0x154   :  { %504 = vst [vmem:[#allocation6 + $0x8] sm:$0xff] %v465_v39  }
 0x159   :  { %v336_v53 = vpop.trf.xlu1 }
 0x161   :  { %v337_v54 = vpop.trf.xlu1 }
 0x162   :  { %v470_v55 = vpack.c.bf16 %v337_v54, %v336_v53 }
 0x164   :  { %505 = vst [vmem:[#allocation6 + $0x10] sm:$0xff] %v470_v55  }
 0x169   :  { %v338_v12 = vpop.trf.xlu1 }
 0x171   :  { %v339_v13 = vpop.trf.xlu1 }
 0x172   :  { %v475_v44 = vpack.c.bf16 %v339_v13, %v338_v12 }
 0x174   :  { %506 = vst [vmem:[#allocation6 + $0x18] sm:$0xff] %v475_v44  }
 0x179   :  { %v340_v56 = vpop.trf.xlu1 }
 0x181   :  { %v341_v42 = vpop.trf.xlu1 }
 0x182   :  { %v480_v0 = vpack.c.bf16 %v341_v42, %v340_v56 }
 0x184   :  { %507 = vst [vmem:[#allocation6 + $0x20] sm:$0xff] %v480_v0  }
 0x189   :  { %v342_v58 = vpop.trf.xlu1 }
 0x191   :  { %v343_v60 = vpop.trf.xlu1 }
 0x192   :  { %v485_v6 = vpack.c.bf16 %v343_v60, %v342_v58 }
 0x194   :  { %508 = vst [vmem:[#allocation6 + $0x28] sm:$0xff] %v485_v6  }
 0x199   :  { %v344_v2 = vpop.trf.xlu1 }
 0x1a1   :  { %v345_v47 = vpop.trf.xlu1 }
 0x1a2   :  { %v490_v46 = vpack.c.bf16 %v345_v47, %v344_v2 }
 0x1a4   :  { %509 = vst [vmem:[#allocation6 + $0x30] sm:$0xff] %v490_v46  }
 0x1a9   :  { %v346_v3 = vpop.trf.xlu1 }
 0x1b1   :  { %v347_v14 = vpop.trf.xlu1 }
 0x1b2   :  { %v495_v59 = vpack.c.bf16 %v347_v14, %v346_v3 }
 0x1b4   :  { %510 = vst [vmem:[#allocation6 + $0x38] sm:$0xff] %v495_v59  }
 0x1b5   :  { %405 = dma.vmem_to_hbm [thread:$0]  %s398_s22, 1024, %s400_s25, [#allocation7], %s632_s20, %s632_s20, %s633_s21  }
 0x1b6   :  { %624 = dma.done.wait [#allocation4], 1024  }
 0x1b7   :  { %625 = vsyncadd [#allocation4], 4294966272 }
 0x1b8   :  { %626 = dma.done.wait [#allocation7], 1024  }
 0x1b9   :  { %627 = vsyncadd [#allocation7], 4294966272 }
 0x1ba   :  { %414 = vsyncpa [#allocation3], 1 }
 0x1bb   :  { %415 = vsyncpa [#allocation4], 1 }
 0x1bc   :  { %416 = vsyncpa [#allocation7], 1 }

</bundles_post_ra>
